<compile_context>
chip_gen: v5e
topology: v5e:2x2
jax: 0.10.0
libtpu: 0.0.40
codegen_flags: <defaults>
</compile_context>

<pallas_src>
import functools

import jax
import jax.numpy as jnp
from jax.experimental import pallas as pl
from jax.experimental.pallas import tpu as pltpu


def _attention_kernel(x_ref, w_ref, b_ref, o_ref):
    # x_ref : (TM, D) f32   row tile of inputs (boundary tile may hold pad rows)
    # w_ref : (D, D)  bf16  resident weight, already transposed to (in, out)
    # b_ref : (1, D)  f32   bias row (resident)
    # o_ref : (TM, D)
    x = x_ref[...]                                    # f32, reused for the gate

    # Linear: logits = x @ W^T + b (W^T materialized once in the wrapper).
    # bf16 MXU inputs, f32 accumulation.
    logits = jnp.dot(x.astype(jnp.bfloat16), w_ref[...],
                     preferred_element_type=jnp.float32)
    logits = logits + b_ref[...]

    # Row-wise softmax over the feature axis (PyTorch dim=1 for 2-D input), f32.
    m = jnp.max(logits, axis=-1, keepdims=True)
    e = jnp.exp(logits - m)
    s = jnp.sum(e, axis=-1, keepdims=True)
    inv = pl.reciprocal(s, approx=True)               # EUP slot (free alongside exp)
    inv = inv * (2.0 - s * inv)                       # one Newton step -> ~exact
    attn = e * inv

    # Gate the inputs (f32) and store.
    o_ref[...] = (x * attn).astype(o_ref.dtype)


def _vmem_budget_bytes():
    """Generation-aware scoped-VMEM budget: physical VMEM minus ~16 MiB headroom,
    capped at 112 MiB (v5e/v6e); falls back to a v7x-safe 48 MiB if unknown."""
    try:
        phys = pltpu.get_tpu_info().vmem_capacity_bytes
    except Exception:
        phys = 64 << 20                               # conservative: v7x per-TC
    return int(max(24 << 20, min(phys - (16 << 20), 112 << 20)))


# Per-row VMEM bytes per feature:
#   x/out tiles double-buffered f32 (2*2*4 = 16) + bf16 x copy (2)
#   + logits/e/attn f32 temporaries (3*4 = 12) + slack (2)  = 32 B.
_ROW_BYTES_PER_FEATURE = 32


def _pick_tm(batch, d, budget_bytes, target=1024):
    """Largest row tile (multiple of 8, <= target) whose real footprint fits the
    VMEM budget after the resident weight, clamped so the grid has >= 2 steps
    (keeps both v7x TensorCores busy)."""
    fixed = d * d * 2 + 8 * d * 4 + (4 << 20)         # bf16 weight + bias tile + slack
    avail = budget_bytes - fixed
    if avail < 8 * _ROW_BYTES_PER_FEATURE * d:
        # TODO(synk): N-tiled weight + online-softmax variant for very large input_dim.
        raise ValueError(
            f"input_dim={d} too large for a resident weight within the "
            f"{budget_bytes >> 20} MiB VMEM budget")
    tm = min(target, (avail // (_ROW_BYTES_PER_FEATURE * d)) // 8 * 8)
    tm = max(8, tm)
    half = max(8, ((-(-batch // 2)) + 7) // 8 * 8)    # round_up(ceil(B/2), 8)
    return min(tm, half)


@functools.partial(jax.jit, static_argnames=("tm", "vmem_limit"))
def _forward(x, weight, bias, *, tm, vmem_limit):
    B, D = x.shape

    # One-time D^2 pass, fused under jit: transposed + bf16-cast weight so the
    # kernel runs a plain (M,K)x(K,N) dot (no per-step XLU weight transposes).
    w_t = weight.T.astype(jnp.bfloat16)
    b_row = bias.reshape(1, D).astype(jnp.float32)

    return pl.pallas_call(
        _attention_kernel,
        out_shape=jax.ShapeDtypeStruct((B, D), x.dtype),
        grid_spec=pltpu.PrefetchScalarGridSpec(
            num_scalar_prefetch=0,
            grid=(pl.cdiv(B, tm),),
            in_specs=[
                pl.BlockSpec((tm, D), lambda i: (i, 0)),            # x row tile
                pl.BlockSpec(memory_space=pltpu.MemorySpace.VMEM),  # weight: single resident copy
                pl.BlockSpec(memory_space=pltpu.MemorySpace.VMEM),  # bias row: resident
            ],
            out_specs=pl.BlockSpec((tm, D), lambda i: (i, 0)),
        ),
        compiler_params=pltpu.CompilerParams(
            dimension_semantics=("parallel",),
            vmem_limit_bytes=vmem_limit),
    )(x, w_t, b_row)


def attention_mechanism(x, weight, bias, *, tm=None):
    """out = x * softmax(x @ weight.T + bias, axis=1)

    x:      (B, D) float32
    weight: (D, D) float32   (PyTorch nn.Linear weight: out_features x in_features)
    bias:   (D,)   float32
    """
    B, D = x.shape
    assert weight.shape == (D, D) and bias.shape == (D,)
    # Feature axis must be lane-aligned so softmax reductions never see pad lanes.
    assert D % 128 == 0, "input_dim must be a multiple of 128 (256 preferred on v6e/v7x)"

    budget = _vmem_budget_bytes()
    if tm is None:
        tm = _pick_tm(B, D, budget)

    return _forward(x, weight, bias, tm=int(tm), vmem_limit=int(budget))


def _reference(x, weight, bias):
    logits = x @ weight.T + bias
    attn = jax.nn.softmax(logits, axis=1)
    return x * attn


if __name__ == "__main__":
    key = jax.random.PRNGKey(0)
    B, D = 8, 128  # batch, input_dim

    kx, kw, kb = jax.random.split(key, 3)
    x = jax.random.normal(kx, (B, D), dtype=jnp.float32)
    # Deterministic "Linear(input_dim, input_dim)" params (PyTorch fan_in scale).
    bound = 1.0 / jnp.sqrt(jnp.float32(D))
    weight = jax.random.uniform(kw, (D, D), dtype=jnp.float32,
                                minval=-bound, maxval=bound)
    bias = jax.random.uniform(kb, (D,), dtype=jnp.float32,
                              minval=-bound, maxval=bound)

    out = attention_mechanism(x, weight, bias)
    out = jax.block_until_ready(out)
    ref = _reference(x, weight, bias)
    assert out.shape == (B, D)
    # bf16 MXU inputs (f32 accumulation) vs the pure-f32 reference: loose tol.
    assert jnp.allclose(out, ref, atol=2e-2, rtol=2e-2), "mismatch vs reference"

    # Also exercise the non-divisible-batch boundary block (no padding path).
    B2 = 13
    x2 = jax.random.normal(kx, (B2, D), dtype=jnp.float32)
    out2 = jax.block_until_ready(attention_mechanism(x2, weight, bias))
    ref2 = _reference(x2, weight, bias)
    assert out2.shape == (B2, D)
    assert jnp.allclose(out2, ref2, atol=2e-2, rtol=2e-2), "mismatch (ragged batch)"

    print("KERNEL_OK")
</pallas_src>

<mosaic_0001>
module attributes {stable_mosaic.version = 11 : i64} {
  func.func @_attention_kernel(%arg0: i32, %arg1: memref<8x128xf32, #tpu.memory_space<vmem>>, %arg2: memref<128x128xbf16, #tpu.memory_space<vmem>>, %arg3: memref<1x128xf32, #tpu.memory_space<vmem>>, %arg4: memref<8x128xf32, #tpu.memory_space<vmem>>) attributes {dimension_semantics = [#tpu.dimension_semantics<parallel>], iteration_bounds = array<i64: 1>, scalar_prefetch = 0 : i64, scratch_operands = 0 : i64, tpu.core_type = #tpu.core_type<tc>, window_params = [{transform_indices = @transform_0, window_bounds = array<i64: 8, 128>}, {pipeline_mode = #tpu.pipeline_mode<synchronous>, transform_indices = @transform_1, window_bounds = array<i64: 128, 128>}, {pipeline_mode = #tpu.pipeline_mode<synchronous>, transform_indices = @transform_2, window_bounds = array<i64: 1, 128>}, {transform_indices = @transform_3, window_bounds = array<i64: 8, 128>}]} {
    %c0 = arith.constant 0 : index
    %c0_0 = arith.constant 0 : index
    %0 = vector.load %arg1[%c0, %c0_0] : memref<8x128xf32, #tpu.memory_space<vmem>>, vector<8x128xf32>
    %1 = arith.truncf %0 : vector<8x128xf32> to vector<8x128xbf16>
    %c0_1 = arith.constant 0 : index
    %c0_2 = arith.constant 0 : index
    %2 = vector.load %arg2[%c0_1, %c0_2] : memref<128x128xbf16, #tpu.memory_space<vmem>>, vector<128x128xbf16>
    %cst = arith.constant dense<0.000000e+00> : vector<8x128xf32>
    %3 = tpu.matmul %1, %2, %cst {dimension_numbers = #tpu.dot_dimension_numbers<[1], [0], [0], [1], [0, 0, 1, 1], [], []>} : vector<8x128xbf16>, vector<128x128xbf16>, vector<8x128xf32> -> vector<8x128xf32>
    %c0_3 = arith.constant 0 : index
    %c0_4 = arith.constant 0 : index
    %4 = vector.load %arg3[%c0_3, %c0_4] : memref<1x128xf32, #tpu.memory_space<vmem>>, vector<1x128xf32>
    %5 = vector.broadcast %4 : vector<1x128xf32> to vector<8x128xf32>
    %6 = arith.addf %3, %5 : vector<8x128xf32>
    %cst_5 = arith.constant dense<0xFF800000> : vector<8xf32>
    %7 = vector.multi_reduction <maximumf>, %6, %cst_5 [1] : vector<8x128xf32> to vector<8xf32>
    %8 = vector.shape_cast %7 : vector<8xf32> to vector<8x1xf32>
    %9 = vector.broadcast %8 : vector<8x1xf32> to vector<8x128xf32>
    %10 = arith.subf %6, %9 : vector<8x128xf32>
    %11 = math.exp %10 : vector<8x128xf32>
    %cst_6 = arith.constant dense<0.000000e+00> : vector<8xf32>
    %12 = vector.multi_reduction <add>, %11, %cst_6 [1] : vector<8x128xf32> to vector<8xf32>
    %13 = vector.shape_cast %12 : vector<8xf32> to vector<8x1xf32>
    %14 = tpu.reciprocal %13 {approx = true} : vector<8x1xf32> -> vector<8x1xf32>
    %15 = arith.mulf %13, %14 : vector<8x1xf32>
    %cst_7 = arith.constant 2.000000e+00 : f32
    %16 = vector.broadcast %cst_7 : f32 to vector<8x1xf32>
    %17 = arith.subf %16, %15 : vector<8x1xf32>
    %18 = arith.mulf %14, %17 : vector<8x1xf32>
    %19 = vector.broadcast %18 : vector<8x1xf32> to vector<8x128xf32>
    %20 = arith.mulf %11, %19 : vector<8x128xf32>
    %21 = arith.mulf %0, %20 : vector<8x128xf32>
    %c0_8 = arith.constant 0 : index
    %c0_9 = arith.constant 0 : index
    %22 = vector.load %arg4[%c0_8, %c0_9] : memref<8x128xf32, #tpu.memory_space<vmem>>, vector<8x128xf32>
    tpu.vector_store %arg4[%c0_8, %c0_9], %21 {strides = array<i32>} : memref<8x128xf32, #tpu.memory_space<vmem>>, vector<8x128xf32>,
    return
  }
  func.func @transform_0(%arg0: i32) -> (i32, i32) {
    %c0_i32 = arith.constant 0 : i32
    %c0_i32_0 = arith.constant 0 : i32
    return %arg0, %c0_i32 : i32, i32
  }
  func.func @transform_1(%arg0: i32) -> (i32, i32) {
    %c0_i32 = arith.constant 0 : i32
    %c0_i32_0 = arith.constant 0 : i32
    %c0_i32_1 = arith.constant 0 : i32
    return %c0_i32, %c0_i32_0 : i32, i32
  }
  func.func @transform_2(%arg0: i32) -> (i32, i32) {
    %c0_i32 = arith.constant 0 : i32
    %c0_i32_0 = arith.constant 0 : i32
    %c0_i32_1 = arith.constant 0 : i32
    return %c0_i32, %c0_i32_0 : i32, i32
  }
  func.func @transform_3(%arg0: i32) -> (i32, i32) {
    %c0_i32 = arith.constant 0 : i32
    %c0_i32_0 = arith.constant 0 : i32
    return %arg0, %c0_i32 : i32, i32
  }
}

</mosaic_0001>

<bundles_post_ra>
// kernel: _forward.1
= control target key start
LH: loop header
LB: loop body
LE: loop exit
PB: predicated region body
PF: predicated region fallthrough
CT: control target
= control target key end

     0   :  { %s254_s0 = inlined_call_operand.vmem [shape: f32[8,128], index: 0, kind: input, shape index: {}]   ;;  %s255_s1 = inlined_call_operand.vmem [shape: bf16[128,128], index: 1, kind: input, shape index: {}]   ;;  %s256_s2 = inlined_call_operand.vmem [shape: f32[1,128], index: 2, kind: input, shape index: {}]   ;;  %s257_s3 = inlined_call_operand.hbm [shape: f32[8,128], index: 3, kind: output, shape index: {}]  }
   0x1   :  { %v167_v0 = vld [vmem:[%s255_s1 + $0x38] sm:$0xff]  ;;  %v166_v1 = vld [vmem:[%s255_s1 + $0x30] sm:$0xff] }
   0x2   :  { %85 = vmatpush.bf16.msra.mxu0 %v167_v0 }
   0x3   :  { %8 = vsyncpa [#allocation3], 0  ;;  %v165_v2 = vld [vmem:[%s255_s1 + $0x28] sm:$0xff]  ;;  %v164_v3 = vld [vmem:[%s255_s1 + $0x20] sm:$0xff]  ;;  %s119_s6 = sshll.u32 %s257_s3, 4  ;;  %s120_s6 = int_to_ptr.hbm [resolvable:$true] %s119_s6 }
   0x4   :  { %v163_v4 = vld [vmem:[%s255_s1 + $0x18] sm:$0xff]  ;;  %v162_v5 = vld [vmem:[%s255_s1 + $0x10] sm:$0xff]  ;;  %v161_v6 = vld [vmem:[%s255_s1 + $0x8] sm:$0xff] }
   0x5   :  { %v160_v7 = vld [vmem:[%s255_s1] sm:$0xff] }
   0x6   :  { %86 = vmatpush.bf16.msra.mxu0 %v166_v1  ;;  %v15_v8 = vld [vmem:[%s254_s0] sm:$0xff]  ;;  %s200_s0 = smov [#allocation2]  }
   0x7   :  { %v16_v9 = vpack.c.bf16 %v15_v8, %v15_v8  ;;  %v169_v10 = vld [vmem:[%s256_s2] ss:$0 sm:$0xff]  ;;  %s117_s1 = sshll.u32 %s200_s0, 4  ;;  %s118_s1 = int_to_ptr.vmem [resolvable:$true] %s117_s1 }
   0xa   :  { %87 = vmatpush.bf16.msra.mxu0 %v165_v2 }
   0xe   :  { %88 = vmatpush.bf16.msra.mxu0 %v164_v3 }
  0x12   :  { %89 = vmatpush.bf16.msra.mxu0 %v163_v4 }
  0x16   :  { %90 = vmatpush.bf16.msra.mxu0 %v162_v5 }
  0x1a   :  { %91 = vmatpush.bf16.msra.mxu0 %v161_v6 }
  0x1e   :  { %92 = vmatpush.bf16.msra.mxu0 %v160_v7 }
  0x21   :  { %93 = vmatmul.bf16.vlgmr.msra.gmra.mxu0 %v16_v9 }
  0x9e   :  { %v94_v11 = vpop.f32.mrf.mxu0 }
  0x9f   :  { %v95_v12 = vadd.f32 %v169_v10, %v94_v11 }
  0xa1   :  { %98 = vmax.xlane.f32.xlu0 %v95_v12 }
  0xa6   :  { %v96_v13 = vpop.f32.mrf.mxu0 }
 0x114   :  { %v99_v14 = vpop.xlane.xlu0 %98 }
 0x115   :  { %v100_v15 = vsub.f32 %v95_v12, %v99_v14 }
 0x117   :  { %v101_v16 = vmul.f32 1.442695, %v100_v15 }
 0x119   :  { %170 = vpow2.f32 %v101_v16 }
 0x11f   :  { %v171_v17 = vpop.eup %170 }
 0x120   :  { %103 = vadd.xlane.f32.xlu0 %v171_v17 }
 0x193   :  { %v104_v18 = vpop.xlane.xlu0 %103 }
 0x194   :  { %172 = vrcp.f32 %v104_v18 }
 0x19a   :  { %v173_v19 = vpop.eup %172 }
 0x19b   :  { %v106_v20 = vmul.f32 %v173_v19, %v104_v18 }
 0x19d   :  { %v107_v21 = vsub.f32 2.0, %v106_v20 }
 0x19f   :  { %v108_v22 = vmul.f32 %v173_v19, %v107_v21 }
 0x1a1   :  { %v109_v23 = vmul.f32 %v171_v17, %v108_v22 }
 0x1a3   :  { %v110_v24 = vmul.f32 %v109_v23, %v15_v8 }
 0x1a5   :  { %111 = vst [vmem:[#allocation2] sm:$0xff] %v110_v24 }
 0x1a6   :  { %122 = dma.vmem_to_hbm [thread:$0]  %s118_s1, 128, %s120_s6, [#allocation3]  }
 0x1a7   :  { %198 = dma.done.wait [#allocation3], 128  }
 0x1a8   :  { %199 = vsyncadd [#allocation3], 4294967168 }
 0x1a9   :  { %127 = vsyncpa [#allocation3], 1 }

</bundles_post_ra>
